<compile_context>
chip_gen: v6e
topology: v6e:2x2x1
jax: 0.10.0
libtpu: 0.0.40
codegen_flags: <defaults>
</compile_context>

<pallas_src>
import functools
import math

import jax
import jax.numpy as jnp
from jax.experimental import pallas as pl
from jax.experimental.pallas import tpu as pltpu


def _round_up(x, m):
    return (x + m - 1) // m * m


def _ocr_ptr_kernel(q_in_ref, k_in_ref, mask_ref,
                    wq_t_ref, bq_ref, wk_t_ref, bk_ref,
                    out_ref, q_scr_ref, *, compute_dtype):
    # q_in_ref : (Bt, DEC_P, H)    k_in_ref : (Bt, OCR_T, H)
    # mask_ref : (Bt, 1, OCR_T)    wq_t/wk_t: (H, H) pre-transposed; scale folded in Wq^T/bq
    # bq/bk    : (1, H)            out_ref  : (Bt, DEC_P, OCR_T)
    # q_scr_ref: (Bt, DEC_P, H) f32 scratch holding the q projection (reused across OCR tiles)
    Bt, DEC_P, H = q_in_ref.shape
    _, OCR_T, _ = k_in_ref.shape
    j = pl.program_id(1)

    # q projection: compute once per batch block (first OCR tile), reuse after.
    @pl.when(j == 0)
    def _():
        # (Bt, DEC_P, H) -> (Bt*DEC_P, H): layout-free merge (DEC_P % 8 == 0),
        # so the projection is ONE big MXU matmul.
        q_in = q_in_ref[...].reshape(Bt * DEC_P, H).astype(compute_dtype)
        q = jnp.dot(q_in, wq_t_ref[...].astype(compute_dtype),
                    preferred_element_type=jnp.float32) + bq_ref[...]
        q_scr_ref[...] = q.reshape(Bt, DEC_P, H)

    k_in = k_in_ref[...].reshape(Bt * OCR_T, H).astype(compute_dtype)
    k = jnp.dot(k_in, wk_t_ref[...].astype(compute_dtype),
                preferred_element_type=jnp.float32) + bk_ref[...]
    k = k.reshape(Bt, OCR_T, H)

    # Batched QK^T contracting the last dims directly (no transpose of K).
    scores = jnp.einsum('bqd,bkd->bqk',
                        q_scr_ref[...].astype(compute_dtype),
                        k.astype(compute_dtype),
                        preferred_element_type=jnp.float32)

    # masked_fill(attention_mask[:, None, :] == 0, -inf); (Bt,1,OCR_T) broadcasts.
    scores = jnp.where(mask_ref[...] == 0, -jnp.inf, scores)
    out_ref[...] = scores.astype(out_ref.dtype)


def ocr_ptr_net(query_inputs, key_inputs, attention_mask, wq, bq, wk, bk,
                *, compute_dtype=jnp.float32):
    """Pallas implementation of OcrPtrNet.forward.

    query_inputs:   (B, DEC, H) float32
    key_inputs:     (B, OCR, H) float32
    attention_mask: (B, OCR)    numeric/bool; ==0 positions are masked to -inf
    wq, wk:         (H, H) float32  (PyTorch nn.Linear weight layout)
    bq, bk:         (H,)   float32
    compute_dtype:  jnp.float32 (exact) or jnp.bfloat16 (MXU-native, f32 accumulation)
    returns:        (B, DEC, OCR) float32
    """
    B, DEC, H = query_inputs.shape
    _, OCR, _ = key_inputs.shape
    f32 = jnp.float32

    # ----- padded logical shapes ---------------------------------------------
    DEC_P = _round_up(DEC, 8)                      # sublane alignment (cheap)
    # Adaptive OCR padding: lane-dense (128) stores only when pad fraction small.
    ocr128 = _round_up(OCR, 128)
    if ocr128 == OCR or (OCR >= 256 and (ocr128 - OCR) * 4 < OCR):
        OCR_PAD = ocr128
    else:
        OCR_PAD = _round_up(OCR, 8)

    # ----- generation-aware VMEM budget ---------------------------------------
    try:
        vmem_cap = int(pltpu.get_tpu_info().vmem_capacity_bytes)
    except Exception:
        vmem_cap = 64 * 1024 * 1024                # conservative: v7x per-core VMEM
    vmem_limit = min(96 * 1024 * 1024, max(32 * 1024 * 1024, (3 * vmem_cap) // 4))
    budget = vmem_limit // 2                       # leave headroom for compiler internals

    weight_bytes = 4 * (2 * H * H + 2 * H)

    def usage_bytes(bt, ocr_t):
        q_blk = 4 * bt * DEC_P * H
        k_blk = 4 * bt * ocr_t * H
        m_blk = 4 * bt * ocr_t
        o_blk = 4 * bt * DEC_P * ocr_t
        blocks = 2 * (q_blk + k_blk + m_blk + o_blk)     # double-buffered pipeline blocks
        scratch = 4 * bt * DEC_P * H                      # q-projection scratch
        interm = 4 * bt * (ocr_t * H + DEC_P * ocr_t)     # in-kernel k-proj + scores (f32)
        return blocks + 2 * weight_bytes + scratch + interm

    # ----- choose OCR tile and batch fold --------------------------------------
    OCR_T = OCR_PAD
    grid_ocr = 1
    if usage_bytes(1, OCR_PAD) > budget:
        # Fallback: tile the OCR axis with lane-dense tiles; the q projection is
        # computed once per batch block (scratch) and reused across tiles.
        OCR_T = 128
        while 2 * OCR_T < OCR and usage_bytes(1, 2 * OCR_T) <= budget:
            OCR_T *= 2
        grid_ocr = pl.cdiv(OCR, OCR_T)
        OCR_PAD = grid_ocr * OCR_T
        Bt = 1
        # TODO(synk): no sub-DEC tiling; an extremely large DEC at Bt=1 can still
        # exceed the VMEM budget (would need a third grid axis over DEC).
    else:
        # Fold batch elements so the projections fill the MXU M dimension
        # (target >= ~256 rows), bounded by the VMEM budget.
        Bt = max(1, min(B, pl.cdiv(256, DEC_P)))
        while Bt > 1 and usage_bytes(Bt, OCR_PAD) > budget:
            Bt -= 1

    grid_b = pl.cdiv(B, Bt)
    if B > 1 and grid_b == 1:
        # Keep >= 2 batch steps so both TensorCores (v7x megacore) get work.
        Bt = pl.cdiv(B, 2)
        grid_b = pl.cdiv(B, Bt)
    if B > 1 and grid_b > 1 and grid_b % 2 == 1:
        # Rebalance Bt so the batch grid splits evenly across the two TCs.
        bt_up = pl.cdiv(B, grid_b - 1)
        bt_dn = pl.cdiv(B, grid_b + 1)
        if pl.cdiv(B, bt_up) % 2 == 0 and usage_bytes(bt_up, OCR_T) <= budget:
            Bt = bt_up
        elif pl.cdiv(B, bt_dn) % 2 == 0:
            Bt = bt_dn
        grid_b = pl.cdiv(B, Bt)
    B_P = grid_b * Bt

    # ----- prepare inputs (zero-copy fast path when already aligned) -----------
    needs_pad = (B_P != B) or (DEC_P != DEC) or (OCR_PAD != OCR)
    qf = query_inputs.astype(f32)
    kf = key_inputs.astype(f32)
    if needs_pad:
        q_p = jnp.zeros((B_P, DEC_P, H), f32).at[:B, :DEC, :].set(qf)
        k_p = jnp.zeros((B_P, OCR_PAD, H), f32).at[:B, :OCR, :].set(kf)
        # Padded mask columns stay 0 -> those score columns become -inf and are
        # sliced off below (invariant relied upon for correctness).
        mask_p = jnp.zeros((B_P, 1, OCR_PAD), jnp.int32).at[:B, 0, :OCR].set(
            attention_mask.astype(jnp.int32))
    else:
        q_p, k_p = qf, kf
        mask_p = attention_mask.astype(jnp.int32).reshape(B, 1, OCR)

    # Pre-transpose weights; fold 1/sqrt(H) into the query branch.
    inv_sqrt_h = 1.0 / math.sqrt(H)
    wq_t = wq.astype(f32).T * inv_sqrt_h
    bq2 = (bq.astype(f32) * inv_sqrt_h).reshape(1, H)
    wk_t = wk.astype(f32).T
    bk2 = bk.astype(f32).reshape(1, H)

    flops = 2 * B_P * (DEC_P + OCR_PAD) * H * H + 2 * B_P * DEC_P * OCR_PAD * H
    bytes_accessed = (4 * B_P * (DEC_P * H + OCR_PAD * H + OCR_PAD + DEC_P * OCR_PAD)
                      + weight_bytes)

    kernel = functools.partial(_ocr_ptr_kernel, compute_dtype=compute_dtype)

    out = pl.pallas_call(
        kernel,
        out_shape=jax.ShapeDtypeStruct((B_P, DEC_P, OCR_PAD), f32),
        grid_spec=pltpu.PrefetchScalarGridSpec(
            num_scalar_prefetch=0,
            grid=(grid_b, grid_ocr),
            in_specs=[
                pl.BlockSpec((Bt, DEC_P, H), lambda b, j: (b, 0, 0)),   # query_inputs
                pl.BlockSpec((Bt, OCR_T, H), lambda b, j: (b, j, 0)),   # key_inputs
                pl.BlockSpec((Bt, 1, OCR_T), lambda b, j: (b, 0, j)),   # attention_mask
                pl.BlockSpec((H, H), lambda b, j: (0, 0)),              # Wq^T (scaled)
                pl.BlockSpec((1, H), lambda b, j: (0, 0)),              # bq (scaled)
                pl.BlockSpec((H, H), lambda b, j: (0, 0)),              # Wk^T
                pl.BlockSpec((1, H), lambda b, j: (0, 0)),              # bk
            ],
            out_specs=pl.BlockSpec((Bt, DEC_P, OCR_T), lambda b, j: (b, 0, j)),
            scratch_shapes=[pltpu.VMEM((Bt, DEC_P, H), jnp.float32)],   # q projection
        ),
        compiler_params=pltpu.CompilerParams(
            dimension_semantics=("parallel", "arbitrary"),
            vmem_limit_bytes=vmem_limit),
        cost_estimate=pl.CostEstimate(
            flops=flops, transcendentals=0, bytes_accessed=bytes_accessed),
    )(q_p, k_p, mask_p, wq_t, bq2, wk_t, bk2)

    if needs_pad:
        out = out[:B, :DEC, :OCR]
    return out


def _reference(query_inputs, key_inputs, attention_mask, wq, bq, wk, bk):
    H = query_inputs.shape[-1]
    with jax.default_matmul_precision("highest"):
        q = query_inputs @ wq.T + bq
        k = key_inputs @ wk.T + bk
        scores = q @ jnp.swapaxes(k, -1, -2) / math.sqrt(H)
    return jnp.where(attention_mask[:, None, :] == 0, -jnp.inf, scores)


if __name__ == "__main__":
    B, DEC, OCR, H = 2, 8, 16, 32

    key = jax.random.PRNGKey(0)
    k1, k2, k3, k4, k5, k6, k7 = jax.random.split(key, 7)

    query_inputs = jax.random.normal(k1, (B, DEC, H), dtype=jnp.float32)
    key_inputs = jax.random.normal(k2, (B, OCR, H), dtype=jnp.float32)
    attention_mask = (jax.random.uniform(k3, (B, OCR)) > 0.3).astype(jnp.int32)

    bound = 1.0 / math.sqrt(H)
    wq = jax.random.uniform(k4, (H, H), minval=-bound, maxval=bound, dtype=jnp.float32)
    bq = jax.random.uniform(k5, (H,), minval=-bound, maxval=bound, dtype=jnp.float32)
    wk = jax.random.uniform(k6, (H, H), minval=-bound, maxval=bound, dtype=jnp.float32)
    bk = jax.random.uniform(k7, (H,), minval=-bound, maxval=bound, dtype=jnp.float32)

    ref = _reference(query_inputs, key_inputs, attention_mask, wq, bq, wk, bk)
    finite = jnp.isfinite(ref)

    # Default f32 MXU path (tight tolerance).
    out = jax.block_until_ready(
        ocr_ptr_net(query_inputs, key_inputs, attention_mask, wq, bq, wk, bk))
    assert out.shape == (B, DEC, OCR)
    assert bool(jnp.all(jnp.isfinite(out) == finite))
    assert bool(jnp.allclose(jnp.where(finite, out, 0.0),
                             jnp.where(finite, ref, 0.0),
                             atol=1e-4, rtol=1e-4))

    # bf16 MXU path (f32 accumulation) — looser tolerance.
    out_bf16 = jax.block_until_ready(
        ocr_ptr_net(query_inputs, key_inputs, attention_mask, wq, bq, wk, bk,
                    compute_dtype=jnp.bfloat16))
    assert out_bf16.shape == (B, DEC, OCR)
    assert bool(jnp.all(jnp.isfinite(out_bf16) == finite))
    assert bool(jnp.allclose(jnp.where(finite, out_bf16, 0.0),
                             jnp.where(finite, ref, 0.0),
                             atol=5e-2, rtol=5e-2))

    print("KERNEL_OK")
</pallas_src>

<mosaic_0001>
module attributes {stable_mosaic.version = 11 : i64} {
  func.func @_ocr_ptr_kernel(%arg0: i32, %arg1: i32, %arg2: memref<1x8x32xf32, #tpu.memory_space<vmem>>, %arg3: memref<1x16x32xf32, #tpu.memory_space<vmem>>, %arg4: memref<1x1x16xi32, #tpu.memory_space<vmem>>, %arg5: memref<32x32xf32, #tpu.memory_space<vmem>>, %arg6: memref<1x32xf32, #tpu.memory_space<vmem>>, %arg7: memref<32x32xf32, #tpu.memory_space<vmem>>, %arg8: memref<1x32xf32, #tpu.memory_space<vmem>>, %arg9: memref<1x8x16xf32, #tpu.memory_space<vmem>>, %arg10: memref<1x8x32xf32, #tpu.memory_space<vmem>>) attributes {dimension_semantics = [#tpu.dimension_semantics<parallel>, #tpu.dimension_semantics<arbitrary>], iteration_bounds = array<i64: 2, 1>, scalar_prefetch = 0 : i64, scratch_operands = 1 : i64, tpu.core_type = #tpu.core_type<tc>, window_params = [{transform_indices = @transform_0, window_bounds = array<i64: 1, 8, 32>}, {transform_indices = @transform_1, window_bounds = array<i64: 1, 16, 32>}, {transform_indices = @transform_2, window_bounds = array<i64: 1, 1, 16>}, {pipeline_mode = #tpu.pipeline_mode<synchronous>, transform_indices = @transform_3, window_bounds = array<i64: 32, 32>}, {pipeline_mode = #tpu.pipeline_mode<synchronous>, transform_indices = @transform_4, window_bounds = array<i64: 1, 32>}, {pipeline_mode = #tpu.pipeline_mode<synchronous>, transform_indices = @transform_5, window_bounds = array<i64: 32, 32>}, {pipeline_mode = #tpu.pipeline_mode<synchronous>, transform_indices = @transform_6, window_bounds = array<i64: 1, 32>}, {transform_indices = @transform_7, window_bounds = array<i64: 1, 8, 16>}]} {
    %c0_i32 = arith.constant 0 : i32
    %0 = arith.cmpi eq, %arg1, %c0_i32 : i32
    %1 = arith.extui %0 : i1 to i32
    %c0_i32_0 = arith.constant 0 : i32
    %2 = arith.cmpi ne, %1, %c0_i32_0 : i32
    scf.if %2 {
      %c0_19 = arith.constant 0 : index
      %c0_20 = arith.constant 0 : index
      %c0_21 = arith.constant 0 : index
      %21 = vector.load %arg2[%c0_19, %c0_20, %c0_21] : memref<1x8x32xf32, #tpu.memory_space<vmem>>, vector<1x8x32xf32>
      %22 = vector.shape_cast %21 : vector<1x8x32xf32> to vector<8x32xf32>
      %c0_22 = arith.constant 0 : index
      %c0_23 = arith.constant 0 : index
      %23 = vector.load %arg5[%c0_22, %c0_23] : memref<32x32xf32, #tpu.memory_space<vmem>>, vector<32x32xf32>
      %cst_24 = arith.constant dense<0.000000e+00> : vector<8x32xf32>
      %24 = tpu.matmul %22, %23, %cst_24 {dimension_numbers = #tpu.dot_dimension_numbers<[1], [0], [0], [1], [0, 0, 1, 1], [], []>} : vector<8x32xf32>, vector<32x32xf32>, vector<8x32xf32> -> vector<8x32xf32>
      %c0_25 = arith.constant 0 : index
      %c0_26 = arith.constant 0 : index
      %25 = vector.load %arg6[%c0_25, %c0_26] : memref<1x32xf32, #tpu.memory_space<vmem>>, vector<1x32xf32>
      %26 = vector.broadcast %25 : vector<1x32xf32> to vector<8x32xf32>
      %27 = arith.addf %24, %26 : vector<8x32xf32>
      %28 = vector.shape_cast %27 : vector<8x32xf32> to vector<1x8x32xf32>
      %c0_27 = arith.constant 0 : index
      %c0_28 = arith.constant 0 : index
      %c0_29 = arith.constant 0 : index
      %29 = vector.load %arg10[%c0_27, %c0_28, %c0_29] : memref<1x8x32xf32, #tpu.memory_space<vmem>>, vector<1x8x32xf32>
      tpu.vector_store %arg10[%c0_27, %c0_28, %c0_29], %28 {strides = array<i32>} : memref<1x8x32xf32, #tpu.memory_space<vmem>>, vector<1x8x32xf32>,
    } else {
    }
    %c0 = arith.constant 0 : index
    %c0_1 = arith.constant 0 : index
    %c0_2 = arith.constant 0 : index
    %3 = vector.load %arg3[%c0, %c0_1, %c0_2] : memref<1x16x32xf32, #tpu.memory_space<vmem>>, vector<1x16x32xf32>
    %4 = vector.shape_cast %3 : vector<1x16x32xf32> to vector<16x32xf32>
    %c0_3 = arith.constant 0 : index
    %c0_4 = arith.constant 0 : index
    %5 = vector.load %arg7[%c0_3, %c0_4] : memref<32x32xf32, #tpu.memory_space<vmem>>, vector<32x32xf32>
    %cst = arith.constant dense<0.000000e+00> : vector<16x32xf32>
    %6 = tpu.matmul %4, %5, %cst {dimension_numbers = #tpu.dot_dimension_numbers<[1], [0], [0], [1], [0, 0, 1, 1], [], []>} : vector<16x32xf32>, vector<32x32xf32>, vector<16x32xf32> -> vector<16x32xf32>
    %c0_5 = arith.constant 0 : index
    %c0_6 = arith.constant 0 : index
    %7 = vector.load %arg8[%c0_5, %c0_6] : memref<1x32xf32, #tpu.memory_space<vmem>>, vector<1x32xf32>
    %8 = vector.broadcast %7 : vector<1x32xf32> to vector<16x32xf32>
    %9 = arith.addf %6, %8 : vector<16x32xf32>
    %10 = vector.shape_cast %9 : vector<16x32xf32> to vector<1x16x32xf32>
    %c0_7 = arith.constant 0 : index
    %c0_8 = arith.constant 0 : index
    %c0_9 = arith.constant 0 : index
    %11 = vector.load %arg10[%c0_7, %c0_8, %c0_9] : memref<1x8x32xf32, #tpu.memory_space<vmem>>, vector<1x8x32xf32>
    "tpu.trace_start"() <{level = 10 : i32, message = "bqd,bkd->bqk"}> : () -> ()
    %cst_10 = arith.constant dense<0.000000e+00> : vector<1x8x16xf32>
    %12 = tpu.matmul %11, %10, %cst_10 {dimension_numbers = #tpu.dot_dimension_numbers<[2], [2], [1], [1], [0, 0, 0, 1, 1, 1], [0], [0]>} : vector<1x8x32xf32>, vector<1x16x32xf32>, vector<1x8x16xf32> -> vector<1x8x16xf32>
    "tpu.trace_stop"() : () -> ()
    %c0_11 = arith.constant 0 : index
    %c0_12 = arith.constant 0 : index
    %c0_13 = arith.constant 0 : index
    %13 = vector.load %arg4[%c0_11, %c0_12, %c0_13] : memref<1x1x16xi32, #tpu.memory_space<vmem>>, vector<1x1x16xi32>
    %c0_i32_14 = arith.constant 0 : i32
    %14 = vector.broadcast %c0_i32_14 : i32 to vector<1x1x16xi32>
    %15 = arith.cmpi eq, %13, %14 : vector<1x1x16xi32>
    %cst_15 = arith.constant 0xFF800000 : f32
    %16 = vector.shape_cast %15 : vector<1x1x16xi1> to vector<1x1x16xi1>
    %17 = vector.broadcast %16 : vector<1x1x16xi1> to vector<1x8x16xi1>
    %18 = vector.broadcast %cst_15 : f32 to vector<1x8x16xf32>
    %19 = arith.select %17, %18, %12 : vector<1x8x16xi1>, vector<1x8x16xf32>
    %c0_16 = arith.constant 0 : index
    %c0_17 = arith.constant 0 : index
    %c0_18 = arith.constant 0 : index
    %20 = vector.load %arg9[%c0_16, %c0_17, %c0_18] : memref<1x8x16xf32, #tpu.memory_space<vmem>>, vector<1x8x16xf32>
    tpu.vector_store %arg9[%c0_16, %c0_17, %c0_18], %19 {strides = array<i32>} : memref<1x8x16xf32, #tpu.memory_space<vmem>>, vector<1x8x16xf32>,
    return
  }
  func.func @transform_0(%arg0: i32, %arg1: i32) -> (i32, i32, i32) {
    %c0_i32 = arith.constant 0 : i32
    %c0_i32_0 = arith.constant 0 : i32
    %c0_i32_1 = arith.constant 0 : i32
    return %arg0, %c0_i32, %c0_i32_0 : i32, i32, i32
  }
  func.func @transform_1(%arg0: i32, %arg1: i32) -> (i32, i32, i32) {
    %c0_i32 = arith.constant 0 : i32
    %c0_i32_0 = arith.constant 0 : i32
    return %arg0, %arg1, %c0_i32 : i32, i32, i32
  }
  func.func @transform_2(%arg0: i32, %arg1: i32) -> (i32, i32, i32) {
    %c0_i32 = arith.constant 0 : i32
    %c0_i32_0 = arith.constant 0 : i32
    return %arg0, %c0_i32, %arg1 : i32, i32, i32
  }
  func.func @transform_3(%arg0: i32, %arg1: i32) -> (i32, i32) {
    %c0_i32 = arith.constant 0 : i32
    %c0_i32_0 = arith.constant 0 : i32
    %c0_i32_1 = arith.constant 0 : i32
    return %c0_i32, %c0_i32_0 : i32, i32
  }
  func.func @transform_4(%arg0: i32, %arg1: i32) -> (i32, i32) {
    %c0_i32 = arith.constant 0 : i32
    %c0_i32_0 = arith.constant 0 : i32
    %c0_i32_1 = arith.constant 0 : i32
    return %c0_i32, %c0_i32_0 : i32, i32
  }
  func.func @transform_5(%arg0: i32, %arg1: i32) -> (i32, i32) {
    %c0_i32 = arith.constant 0 : i32
    %c0_i32_0 = arith.constant 0 : i32
    %c0_i32_1 = arith.constant 0 : i32
    return %c0_i32, %c0_i32_0 : i32, i32
  }
  func.func @transform_6(%arg0: i32, %arg1: i32) -> (i32, i32) {
    %c0_i32 = arith.constant 0 : i32
    %c0_i32_0 = arith.constant 0 : i32
    %c0_i32_1 = arith.constant 0 : i32
    return %c0_i32, %c0_i32_0 : i32, i32
  }
  func.func @transform_7(%arg0: i32, %arg1: i32) -> (i32, i32, i32) {
    %c0_i32 = arith.constant 0 : i32
    %c0_i32_0 = arith.constant 0 : i32
    return %arg0, %c0_i32, %arg1 : i32, i32, i32
  }
}

</mosaic_0001>

<bundles_post_ra>
// kernel: tpu_custom_call.1
= control target key start
LH: loop header
LB: loop body
LE: loop exit
PB: predicated region body
PF: predicated region fallthrough
CT: control target
= control target key end

     0   :  { %s1498_s0 = inlined_call_operand.hbm [shape: f32[2,8,32], index: 0, kind: input, shape index: {}]   ;;  %s1499_s1 = inlined_call_operand.hbm [shape: f32[2,16,32], index: 1, kind: input, shape index: {}]   ;;  %s1500_s2 = inlined_call_operand.vmem [shape: s32[2,1,16], index: 2, kind: input, shape index: {}]   ;;  %s1501_s3 = inlined_call_operand.hbm [shape: f32[32,32], index: 3, kind: input, shape index: {}]   ;;  %s1502_s4 = inlined_call_operand.vmem [shape: f32[1,32], index: 4, kind: input, shape index: {}]   ;;  %s1503_s5 = inlined_call_operand.hbm [shape: f32[32,32], index: 5, kind: input, shape index: {}]   ;;  %s1504_s6 = inlined_call_operand.vmem [shape: f32[1,32], index: 6, kind: input, shape index: {}]   ;;  %s1505_s7 = inlined_call_operand.hbm [shape: f32[2,8,16], index: 7, kind: output, shape index: {}]  }
   0x1   :  { %1510 = sst [smem:[#allocation20_spill]] %s1498_s0 }
   0x2   :  { %1511 = sst [smem:[#allocation21_spill]] %s1501_s3 }
   0x3   :  { %1512 = sst [smem:[#allocation22_spill]] %s1503_s5 }
   0x4   :  { %12 = vsyncpa [#allocation4], 0 }
   0x5   :  { %14 = vsyncpa [#allocation4 + $0x1], 0 }
   0x6   :  { %15 = vsyncpa [#allocation7], 0 }
   0x7   :  { %17 = vsyncpa [#allocation7 + $0x1], 0 }
   0x8   :  { %18 = vsyncpa [#allocation10], 0 }
   0x9   :  { %19 = vsyncpa [#allocation5], 0 }
   0xa   :  { %21 = vsyncpa [#allocation5 + $0x1], 0  ;;  %s1253_s24 = smov 0   ;;  %s1255_s25 = smov 0  }
   0xb   :  { %s1257_s26 = smov 0   ;;  %s1259_s27 = smov 0  }
   0xc   :  { %s1261_s28 = smov 0   ;;  %s1263_s29 = smov 0  }
   0xd LB: > { %1513 = sst [smem:[#allocation17_spill]] %s1189_s26  ;;  %s1284_s30 = sadd.s32 4294967295, %s1201_s29   ;;  %s1201_s29 = sphi %s1263_s29, %s27_s29   ;;  %s1197_s28 = sphi %s1261_s28, %s1534_s28   ;;  %s1193_s27 = sphi %s1259_s27, %s1533_s27   ;;  %s1189_s26 = sphi %s1257_s26, %s1529_s26   ;;  %s1185_s25 = sphi %s1255_s25, %s1532_s25   ;;  %s1181_s24 = sphi %s1253_s24, %s1531_s24  }
   0xe   : > { %s836_s8 = sadd.s32 4294967294, %s1201_s29   ;;  %p59_p0 = scmp.ne.s32.totalorder %s1185_s25, %s1181_s24 }
   0xf   : > { %p60_p1 = scmp.eq.s32.totalorder %s1284_s30, 0  ;;  %p225_p2 = scmp.eq.s32.totalorder %s1284_s30, 1 }
  0x10   : > { %p231_p3 = scmp.eq.s32.totalorder %s836_s8, 1  ;;  %p837_p5 = scmp.ge.s32.totalorder %s1201_s29, 1 }
  0x11   : > { %p1293_p4 = por %p60_p1, %p59_p0  ;;  %p238_p7 = scmp.lt.s32.totalorder %s1201_s29, 3 }
  0x12   : > { %p1298_p6 = por %p231_p3, %p59_p0  ;;  %s1203_s12 = smov [#allocation8]  }
  0x13   : > { %p1303_p8 = pnand %p837_p5, %p238_p7  ;;  %s250_s13 = sshll.u32 %s1203_s12, 4  ;;  %s251_s13 = int_to_ptr.vmem [resolvable:$true] %s250_s13 }
  0x14   : > { %s1204_s15 = smov [#allocation9]   ;;  %s1012_s17 = scalar_lea.vmem %s251_s13, 512 }
  0x15   : > { %p922_p9 = pneg %p1303_p8  ;;  %s266_s16 = sshll.u32 %s1204_s15, 4  ;;  %s267_s16 = int_to_ptr.vmem [resolvable:$true] %s266_s16 }
  0x16   : > { %p1013_p13 = scmp.ne.s32.totalorder %s251_s13, %s1012_s17  ;;  %p1020_p5 = scmp.lt.s32.totalorder %s251_s13, %s251_s13 }
  0x17   : > { %p1312_p11 = pnand %p922_p9, %p60_p1  ;;  %p1021_p7 = scmp.lt.s32.totalorder %s1012_s17, %s1012_s17 }
  0x19   : > { %p1003_p12 = pneg %p1312_p11  ;;  %p1022_p10 = por %p1021_p7, %p1020_p5 }
  0x1b   : > { %p1015_p0 = pnand %p1013_p13, %p1003_p12 }
  0x1d   : > { %p1016_p3 = pneg %p1015_p0 }
  0x1f   : > { %p1023_p9 = pnand %p1022_p10, %p1016_p3 }
  0x21   : > { %1026 = shalt.err (!%p1023_p9)
}
  0x22   : > { %s1506_s18 = smov 128   ;;  %s1507_s19 = smov 8  }
  0x23   : > { %s1518_s3 = sld [smem:[#allocation21_spill]]  ;;  %s1038_s22 = scalar_lea.vmem %s267_s16, 512 }
  0x24   : > { %p1039_p13 = scmp.ne.s32.totalorder %s267_s16, %s1038_s22  ;;  %p1046_p10 = scmp.lt.s32.totalorder %s267_s16, %s267_s16 }
  0x25   : > { %p1047_p3 = scmp.lt.s32.totalorder %s1038_s22, %s1038_s22 }
  0x26   : > { %p1041_p0 = pnand %p1039_p13, %p1003_p12 }
  0x27   : > { %p1048_p7 = por %p1047_p3, %p1046_p10 }
  0x28   : > { %p1042_p5 = pneg %p1041_p0 }
  0x29   : > { %925 = dma.hbm_to_vmem [thread:$0]  (!%p1312_p11), %s1518_s3, 512, %s251_s13, [#allocation7], %s1506_s18, %s1506_s18, %s1507_s19  }
  0x2a   : > { %p1049_p9 = pnand %p1048_p7, %p1042_p5 }
  0x2c   : > { %1052 = shalt.err (!%p1049_p9)
}
  0x2d   : > { %s1519_s5 = sld [smem:[#allocation22_spill]]  ;;  %s39_s12 = sadd.s32 1, %s1197_s28 }
  0x2e   : > { %s46_s13 = sadd.s32 1, %s1189_s26  ;;  %p41_p12 = scmp.ge.s32.totalorder %s39_s12, 2 }
  0x2f   : > { %p53_p13 = scmp.ne.s32.totalorder %s1189_s26, %s1185_s25  ;;  %p54_p0 = scmp.eq.s32.totalorder %s1201_s29, 0 }
  0x30   : > { %p942_p5 = scmp.lt.s32.totalorder %s1201_s29, 2  ;;  %s1536_s12 = smov (%p41_p12, %s39_s12), 0 }
  0x31   : > { %1520 = sst [smem:[#allocation18_spill]] %s1536_s12  ;;  %p55_p10 = por %p54_p0, %p53_p13 }
  0x32   : > { %p1350_p3 = por %p225_p2, %p53_p13  ;;  %s43_s15 = ssub.s32 %s1197_s28, %s1536_s12 }
  0x33   : > { %928 = dma.hbm_to_vmem [thread:$0]  (!%p1312_p11), %s1519_s5, 512, %s267_s16, [#allocation10], %s1506_s18, %s1506_s18, %s1507_s19  }
  0x34   : > { %s283_s17 = sand.u32 1, %s1189_s26   ;;  %p44_p7 = scmp.eq.s32.totalorder %s43_s15, 0 }
  0x35   : > { %s841_s16 = sshll.u32 %s283_s17, 3  ;;  %s842_s20 = sshll.u32 %s1197_s28, 7 }
  0x36   : > { %s1359_s21 = scalar_select %p44_p7, %s1189_s26, %s46_s13  }
  0x37   : > { %s1523_s0 = sld [smem:[#allocation20_spill]]  ;;  %s287_s18 = scalar_lea.vmem [#allocation3], %s841_s16 }
  0x38   : > { %1522 = sst [smem:[#allocation19_spill]] %s1359_s21  ;;  %s294_s19 = sshll.u32 %s287_s18, 4  ;;  %s295_s19 = int_to_ptr.vmem [resolvable:$true] %s294_s19 }
  0x39   : > { %p1366_p11 = pnand %p942_p5, %p55_p10  ;;  %s843_s5 = sshll.u32 %s283_s17, 4 }
  0x3a   : > { %s284_s15 = scalar_lea.sflag [#allocation4], %s283_s17  ;;  %s1066_s13 = scalar_lea.vmem %s295_s19, 128 }
  0x3b   : > { %p1055_p2 = pneg %p1366_p11  ;;  %p1067_p9 = scmp.ne.s32.totalorder %s295_s19, %s1066_s13 }
  0x3c   : > { %s1207_s16 = smov [#allocation3]  }
  0x3d   : > { %s292_s8 = scalar_lea.hbm %s1523_s0, %s842_s20  ;;  %p1069_p12 = pnand %p1067_p9, %p1055_p2 }
  0x3e   : > { %s1071_s18 = sshll.u32 %s1207_s16, 4  ;;  %s1072_s18 = int_to_ptr.vmem [resolvable:$false] %s1071_s18 }
  0x3f   : > { %p1070_p13 = pneg %p1069_p12  ;;  %s1073_s20 = scalar_lea.vmem %s1072_s18, 256 }
  0x40   : > { %p1074_p0 = scmp.lt.s32.totalorder %s295_s19, %s1072_s18  ;;  %p1075_p5 = scmp.lt.s32.totalorder %s1073_s20, %s1066_s13 }
  0x42   : > { %p1076_p10 = por %p1075_p5, %p1074_p0 }
  0x44   : > { %p1077_p7 = pnand %p1076_p10, %p1070_p13 }
  0x46   : > { %1080 = shalt.err (!%p1077_p7)
}
  0x47   : > { %932 = dma.hbm_to_vmem [thread:$0]  (!%p1366_p11), %s292_s8, 128, %s295_s19, %s284_s15  }
  0x48   : > { %s864_s17 = sshll.u32 %s1197_s28, 8  ;;  %s305_s22 = scalar_lea.vmem [#allocation6], %s843_s5 }
  0x49   : > { %s314_s23 = sshll.u32 %s305_s22, 4  ;;  %s301_s0 = sand.u32 1, %s1201_s29   ;;  %s315_s23 = int_to_ptr.vmem [resolvable:$true] %s314_s23 }
  0x4a   : > { %s313_s21 = scalar_lea.hbm %s1499_s1, %s864_s17  ;;  %s302_s18 = scalar_lea.sflag [#allocation7], %s301_s0 }
  0x4b   : > { %s1094_s13 = scalar_lea.vmem %s315_s23, 256  ;;  %s1208_s20 = smov [#allocation6]  }
  0x4c   : > { %p1095_p9 = scmp.ne.s32.totalorder %s315_s23, %s1094_s13  ;;  %s1099_s26 = sshll.u32 %s1208_s20, 4  ;;  %s1100_s26 = int_to_ptr.vmem [resolvable:$false] %s1099_s26 }
  0x4d   : > { %s1101_s19 = scalar_lea.vmem %s1100_s26, 512  ;;  %p1102_p0 = scmp.lt.s32.totalorder %s315_s23, %s1100_s26 }
  0x4e   : > { %p1097_p12 = pnand %p1095_p9, %p1055_p2  ;;  %p1103_p5 = scmp.lt.s32.totalorder %s1101_s19, %s1094_s13 }
  0x50   : > { %p1098_p13 = pneg %p1097_p12  ;;  %p1104_p10 = por %p1103_p5, %p1102_p0 }
  0x52   : > { %p1105_p7 = pnand %p1104_p10, %p1098_p13 }
  0x54   : > { %1108 = shalt.err (!%p1105_p7)
}
  0x55   : > { %s1525_s5 = smov 8   ;;  %s1526_s12 = smov 128  }
  0x56   : > { %935 = dma.hbm_to_vmem [thread:$0]  (!%p1366_p11), %s313_s21, 256, %s315_s23, %s302_s18, %s1526_s12, %s1526_s12, %s1525_s5  }
  0x57   : > { %335 = sbr.rel (%p1303_p8) target bundleno = 520 (0x208), region = 48  ;;  %s1393_s0 = sand.u32 (!%p1303_p8), 1, %s1185_s25  }
  0x58   : > { %s847_s26 = sshll.u32 (!%p1303_p8), %s1393_s0, 3  ;;  %s338_s8 = scalar_lea.sflag (!%p1303_p8), [#allocation4], %s1393_s0 }
  0x59   : > { %s1399_s15 = scalar_lea.vmem (!%p1303_p8), [#allocation3], %s847_s26 }
  0x5c   : > { %1160 = dma.done.wait (%p1293_p4), %s338_s8, 128  }
  0x5d   : > { %1162 = vsyncadd (%p1293_p4), %s338_s8, 4294967168  ;;  %s346_s3 = sand.u32 1, %s1284_s30   ;;  %s848_s11 = sshll.u32 %s1393_s0, 4 }
  0x5e   : > { %s347_s21 = scalar_lea.sflag [#allocation7], %s346_s3  ;;  %s1407_s17 = scalar_lea.vmem [#allocation6], %s848_s11 }
  0x5f   : > { %1164 = dma.done.wait (%p1293_p4), %s347_s21, 256  }
  0x60   : > { %1166 = vsyncadd (%p1293_p4), %s347_s21, 4294967040 }
  0x61   : > { %1168 = dma.done.wait (%p60_p1), [#allocation7], 512  }
  0x62   : > { %1170 = vsyncadd (%p60_p1), [#allocation7], 4294966784 }
  0x63   : > { %1172 = dma.done.wait (%p60_p1), [#allocation10], 512  }
  0x64   : > { %1174 = vsyncadd (%p60_p1), [#allocation10], 4294966784  ;;  %v1209_v0 = vmov 0.0   ;;  %vm1210_vm0 = vmmov 0   ;;  %v415_v1 = vld [vmem:[#allocation8 + $0x18] sm:$0xff]  ;;  %v414_v3 = vld [vmem:[#allocation8 + $0x10] sm:$0xff]  ;;  %v676_v22 = vlaneseq }
  0x65   : > { %879 = vmatprep.subr.mxu0 %v1209_v0  ;;  %887 = vmatprep.mubr.msk.f32.mxu0 %vm1210_vm0, %v1209_v0  ;;  %v503_v2 = vld [vmem:[#allocation9 + $0x18] sm:$0xff]  ;;  %v502_v4 = vld [vmem:[#allocation9 + $0x10] sm:$0xff]  ;;  %v413_v5 = vld [vmem:[#allocation8 + $0x8] sm:$0xff]  ;;  %vm423_vm1 = vcmask 261120   ;;  %p401_p1 = scmp.lt.s32.totalorder %s1193_s27, 1  ;;  %v1211_v26 = vmov 0  }
  0x66   : > { %880 = vmatpush3.msra.mxu0 %v415_v1  ;;  %890 = vmatprep.subr.mxu1 %v503_v2  ;;  %v501_v6 = vld [vmem:[#allocation9 + $0x8] sm:$0xff]  ;;  %v412_v7 = vld [vmem:[#allocation8] sm:$0xff]  ;;  %v411_v9 = vld [vmem:[%s1399_s15] sm:$0xff]  ;;  %v677_v24 = vshrl.u32 %v676_v22, 7  ;;  %s861_s19 = sshll.u32 %s1193_s27, 7  ;;  %s399_s5 = scalar_lea.vmem [#allocation11], %s847_s26 }
  0x67   : > { %881 = vmatprep.subr.mxu0 %v1209_v0  ;;  %891 = vmatpush3.msra.mxu1 %v503_v2  ;;  %v500_v8 = vld [vmem:[#allocation9] sm:$0xff]  ;;  %v499_v11 = vld [vmem:[%s1407_s17 + $0x8] sm:$0xff]  ;;  %s402_s16 = scalar_select %p401_p1, %s1193_s27, 1  ;;  %vm682_vm4 = vcmask 130048  }
  0x68   : > { %882 = vmatpush3.msra.mxu0 %v414_v3  ;;  %892 = vmatprep.subr.mxu1 %v502_v4  ;;  %v498_v10 = vld [vmem:[%s1407_s17] sm:$0xff]  ;;  %v852_v12 = vld [vmem:[%s1502_s4] ss:$0 sm:$0xff]  ;;  %v678_v25 = vsub.s32 0, %v677_v24  ;;  %s699_s12 = sshll.u32 %s399_s5, 4  ;;  %s1450_s3 = scalar_lea.hbm %s1505_s7, %s861_s19  ;;  %s1452_s12 = int_to_ptr.vmem [resolvable:$true] %s699_s12 }
  0x69   : > { %883 = vmatprep.subr.mxu0 %v1209_v0  ;;  %893 = vmatpush3.msra.mxu1 %v502_v4  ;;  %v854_v14 = vld [vmem:[%s1504_s6] ss:$0 sm:$0xff]  ;;  %s406_s20 = scalar_lea.vmem %s1500_s2, %s402_s16  ;;  %s685_s27 = scalar_lea.sflag [#allocation5], %s1393_s0 }
  0x6a   : > { %884 = vmatpush3.msra.mxu0 %v413_v5  ;;  %894 = vmatprep.subr.mxu1 %v501_v6  ;;  %v673_v23 = vld [vmem:[%s406_s20] sm:$0x1]  ;;  %s1109_s11 = scalar_lea.vmem %s1452_s12, 128  ;;  %s1212_s26 = smov [#allocation11]  }
  0x6b   : > { %885 = vmatprep.subr.mxu0 %v1209_v0  ;;  %895 = vmatpush3.msra.mxu1 %v501_v6  ;;  %vm674_vm2 = vcmp.eq.s32.totalorder %v673_v23, 0  ;;  %p1110_p4 = scmp.ne.s32.totalorder %s1452_s12, %s1109_s11  ;;  %s1113_s21 = sshll.u32 %s1212_s26, 4  ;;  %s1114_s21 = int_to_ptr.vmem [resolvable:$false] %s1113_s21 }
  0x6c   : > { %886 = vmatpush3.msra.mxu0 %v412_v7  ;;  %896 = vmatprep.subr.mxu1 %v500_v8  ;;  %v675_v27 = vsel %vm674_vm2, 1, %v1211_v26  ;;  %s1115_s17 = scalar_lea.vmem %s1114_s21, 256  ;;  %p1116_p2 = scmp.lt.s32.totalorder %s1452_s12, %s1114_s21 }
  0x6d   : > { %888 = vmatmul.mubr.msk.f32.vlgmr.msra.gmra.mxu0 %vm423_vm1, %v411_v9  ;;  %897 = vmatpush3.msra.mxu1 %v500_v8  ;;  %v679_v28 = vrot.slane %v675_v27, %v678_v25  ;;  %p1111_p8 = pnand %p1110_p4, %p1350_p3  ;;  %p1117_p9 = scmp.lt.s32.totalorder %s1115_s17, %s1109_s11 }
  0x6e   : > { %898 = vmatprep.mubr.msk.f32.mxu1 %vm423_vm1, %v498_v10  ;;  %901 = vmatprep.subr.mxu0 %v1209_v0 }
  0x6f   : > { %899 = vmatmul.mubr.msk.f32.vlgmr.msra.gmra.mxu1 %vm423_vm1, %v499_v11  ;;  %905 = vmatprep.mubr.msk.f32.mxu0 %vm1210_vm0, %v1209_v0  ;;  %vm680_vm3 = vcmp.eq.s32.totalorder %v679_v28, 1  ;;  %p1112_p11 = pneg %p1111_p8  ;;  %p1118_p12 = por %p1117_p9, %p1116_p2 }
  0x71   : > { %p1119_p13 = pnand %p1118_p12, %p1112_p11 }
 0x12d   : > { %v493_v13 = vpop.f32.mrf.mxu0 }
 0x12e   : > { %v494_v15 = vadd.f32 %v852_v12, %v493_v13 }
 0x12f   : > { %v900_v16 = vpop.f32.mrf.mxu1  ;;  %v889_v17 = vpop.f32.mrf.mxu0 }
 0x130   : > { %497 = vst.msk [vmem:[#allocation2] sm:$0xff] %vm423_vm1, %v494_v15  ;;  %v590_v18 = vadd.f32 %v900_v16, %v854_v14 }
 0x131   : > { %v584_v19 = vpop.f32.mrf.mxu1 }
 0x132   : > { %902 = vmatpush3.xpose.msk.msra.mxu0 %vm423_vm1, %v590_v18  ;;  %v585_v20 = vadd.f32 %v854_v14, %v584_v19 }
 0x133   : > { %903 = vmatprep.subr.mxu0 %v1209_v0 }
 0x136   : > { %904 = vmatpush3.xpose.msk.msra.mxu0 %vm423_vm1, %v585_v20 }
 0x137   : > { %v593_v21 = vld [vmem:[#allocation2] sm:$0xff] }
 0x139   : > { %906 = vmatmul.mubr.msk.f32.vlgmr.msra.gmra.mxu0 %vm423_vm1, %v593_v21 }
 0x1f9   : > { %v669_v29 = vpop.f32.mrf.mxu0 }
 0x1fa   : > { %v681_v30 = vsel %vm680_vm3, -inf, %v669_v29 }
 0x1fb   : > { %683 = vst.msk [vmem:[%s399_s5] sm:$0xff] %vm682_vm4, %v681_v30  ;;  %v907_v31 = vpop.f32.mrf.mxu0 }
 0x1fc   : > { %1122 = shalt.err (!%p1119_p13)
}
 0x1fd   : > { %s1123_s30 = scalar_lea.hbm %s1450_s3, 128  ;;  %s1127_s22 = scalar_lea.hbm %s1505_s7, 256 }
 0x1fe   : > { %p1124_p0 = scmp.ne.s32.totalorder %s1450_s3, %s1123_s30  ;;  %p1128_p7 = scmp.lt.s32.totalorder %s1450_s3, %s1505_s7 }
 0x1ff   : > { %p1129_p1 = scmp.lt.s32.totalorder %s1127_s22, %s1123_s30 }
 0x200   : > { %p1125_p5 = pnand %p1124_p0, %p1350_p3 }
 0x201   : > { %p1130_p4 = por %p1129_p1, %p1128_p7 }
 0x202   : > { %p1126_p10 = pneg %p1125_p5 }
 0x204   : > { %p1131_p8 = pnand %p1130_p4, %p1126_p10 }
 0x206   : > { %1134 = shalt.err (!%p1131_p8)
}
 0x207   : > { %920 = dma.vmem_to_hbm [thread:$0]  (%p1350_p3), %s1452_s12, 128, %s1450_s3, %s685_s27  }
 0x208 PF: > { %s711_s18 = sand.u32 1, %s1181_s24   ;;  %p1527_p11 = scmp.ge.s32.totalorder %s1201_s29, 2 }
 0x209   : > { %s712_s13 = scalar_lea.sflag [#allocation5], %s711_s18 }
 0x20a   : > { %p937_p2 = pnand %p1527_p11, %p1298_p6 }
 0x20c   : > { %p938_p9 = pneg %p937_p2 }
 0x20e   : > { %1176 = dma.done.wait (%p938_p9), %s712_s13, 128  }
 0x20f   : > { %1178 = vsyncadd (%p938_p9), %s712_s13, 4294967168  ;;  %s27_s29 = sadd.s32 1, %s1201_s29   ;;  %s1528_s14 = sld [smem:[#allocation17_spill]] }
 0x210   : > { %p24_p12 = scmp.ge.s32.totalorder %s27_s29, 4   ;;  %s1529_s26 = sld [smem:[#allocation19_spill]] }
 0x211   : > { %s1530_s20 = sld [smem:[#allocation18_spill]]  ;;  %s1531_s24 = smov %s1185_s25 }
 0x212   : > { %s1533_s27 = smov %s1197_s28 }
 0x213   :  { %26 = sbr.rel (!%p24_p12) target bundleno = 13 (0xd), region = 121 }
 0x215   : > { %s1532_s25 = smov %s1528_s14 }
 0x217   : > { %s1534_s28 = smov %s1530_s20 }
 0x218   :  { %717 = vsyncpa [#allocation4], 1 }
 0x219   :  { %719 = vsyncpa [#allocation4 + $0x1], 1 }
 0x21a   :  { %720 = vsyncpa [#allocation7], 1 }
 0x21b   :  { %722 = vsyncpa [#allocation7 + $0x1], 1 }
 0x21c   :  { %723 = vsyncpa [#allocation10], 1 }
 0x21d   :  { %724 = vsyncpa [#allocation5], 1 }
 0x21e   :  { %726 = vsyncpa [#allocation5 + $0x1], 1 }

</bundles_post_ra>
